<compile_context>
chip_gen: v7x
topology: tpu7x:2x2x1
jax: 0.10.0
libtpu: 0.0.40
codegen_flags: <defaults>
</compile_context>

<pallas_src>
import functools
import math

import jax
import jax.numpy as jnp
from jax.experimental import pallas as pl
from jax.experimental.pallas import tpu as pltpu


def _round_up(n, m):
    return ((n + m - 1) // m) * m


def _net_kernel(x_ref, w1_ref, b1_ref, w2_ref, b2_ref, wh_ref, bh_ref,
                out_ref, *, discrete_dim, continuous_dim):
    x = x_ref[...]

    # torch.nan_to_num(x, nan=0.0, posinf=1.0, neginf=-1.0)  (2 VPU selects)
    x = jnp.where(jnp.isnan(x), jnp.float32(0.0), x)
    x = jnp.where(jnp.isinf(x),
                  jnp.where(x > 0, jnp.float32(1.0), jnp.float32(-1.0)), x)

    # shared_fc: bf16 MXU matmuls with f32 accumulation; bias/ReLU in f32.
    h1 = jnp.dot(x.astype(jnp.bfloat16), w1_ref[...],
                 preferred_element_type=jnp.float32) + b1_ref[...]
    h1 = jnp.maximum(h1, 0.0)
    h2 = jnp.dot(h1.astype(jnp.bfloat16), w2_ref[...],
                 preferred_element_type=jnp.float32) + b2_ref[...]
    h2 = jnp.maximum(h2, 0.0)

    # fused heads: one lane-dense [TILE_B, 128] matmul for disc|mu|sigma|value
    z = jnp.dot(h2.astype(jnp.bfloat16), wh_ref[...],
                preferred_element_type=jnp.float32) + bh_ref[...]

    D, C = discrete_dim, continuous_dim
    col = jax.lax.broadcasted_iota(jnp.int32, z.shape, dimension=1)
    is_mu = jnp.logical_and(col >= D, col < D + C)

    # One shared transcendental chain (3 EUP passes: exp, approx-recip, log1p)
    #   t = exp(-|z|)        on sigmoid/softplus/value lanes
    #   t = exp(-2|z|)       on tanh (mu) lanes
    #   r = 1/(1+t)
    #   sigmoid(z) = r            (z>=0)   | 1-r        (z<0)
    #   tanh(z)    = 2r-1         (z>=0)   | 1-2r       (z<0)
    #   softplus(z)= max(z,0) + log1p(t)
    # Only exp of non-positive arguments -> no overflow/Inf edge cases.
    az = jnp.abs(z)
    t = jnp.exp(-jnp.where(is_mu, 2.0 * az, az))
    r = pl.reciprocal(1.0 + t, approx=True)
    pos = z >= 0.0

    sig = jnp.clip(jnp.where(pos, r, 1.0 - r), 0.01, 0.99)
    th = jnp.where(pos, 2.0 * r - 1.0, 1.0 - 2.0 * r)
    sp = jnp.clip(jnp.maximum(z, 0.0) + jnp.log1p(t) + 0.01, 0.1, 1.0)

    # select per-column activation (value head + pad lanes pass through z;
    # pad lanes of the fused head weights/bias are zero, so they carry 0.0)
    out = jnp.where(col < D, sig,
          jnp.where(col < D + C, th,
          jnp.where(col < D + 2 * C, sp, z)))
    out_ref[...] = out


def prepare_params(params):
    """Pad hidden dims to 128 and fuse the four heads ONCE, outside the
    per-call path.  Weights are emitted in bf16 (MXU operands), biases in f32
    (accumulator precision).  Zero pad rows/cols + zero biases keep the real
    lanes mathematically identical."""
    s_dim, hidden1 = params["w1"].shape
    hidden2 = params["w2"].shape[1]
    D = params["wd"].shape[1]
    C = params["wmu"].shape[1]
    H1P = _round_up(hidden1, 128)
    H2P = _round_up(hidden2, 128)
    HP = _round_up(D + 2 * C + 1, 128)

    def pad2(a, rows, cols, dtype):
        a = jnp.pad(a, ((0, rows - a.shape[0]), (0, cols - a.shape[1])))
        return a.astype(dtype)

    wh = jnp.concatenate(
        [params["wd"], params["wmu"], params["wsig"], params["wv"]], axis=1)
    bh = jnp.concatenate(
        [params["bd"], params["bmu"], params["bsig"], params["bv"]], axis=1)
    return dict(
        w1=pad2(params["w1"], s_dim, H1P, jnp.bfloat16),
        b1=pad2(params["b1"], 1, H1P, jnp.float32),
        w2=pad2(params["w2"], H1P, H2P, jnp.bfloat16),
        b2=pad2(params["b2"], 1, H2P, jnp.float32),
        wh=pad2(wh, H2P, HP, jnp.bfloat16),
        bh=pad2(bh, 1, HP, jnp.float32),
    )


def net_forward(x, prep, discrete_dim, continuous_dim, *, tile_b=1024):
    """Full Net forward as one batch-tiled Pallas kernel with fused heads.

    `prep` must come from prepare_params() (cached; not rebuilt per call).
    """
    B, s_dim = x.shape
    assert prep["w1"].shape[0] == s_dim
    H1P = prep["w1"].shape[1]
    H2P = prep["w2"].shape[1]
    HP = prep["wh"].shape[1]

    # Batch tiling: sublane multiple of 8.  Cap the tile at ceil(B/2) so the
    # grid has >= 2 steps whenever B > 8 and the "parallel" axis can shard
    # across v7x's two TensorCores; cap at tile_b to bound VMEM per step.
    B8 = _round_up(B, 8)
    half = _round_up(-(-B8 // 2), 8)
    TILE_B = max(8, min(tile_b, half))
    B_pad = _round_up(B8, TILE_B)
    if B_pad != B:
        x = jnp.pad(x, ((0, B_pad - B), (0, 0)))
    grid = (B_pad // TILE_B,)

    kernel = functools.partial(
        _net_kernel, discrete_dim=discrete_dim, continuous_dim=continuous_dim)

    flops = 2 * B_pad * (s_dim * H1P + H1P * H2P + H2P * HP)
    bytes_accessed = (4 * B_pad * (s_dim + HP)                       # x + out (f32)
                      + 2 * (s_dim * H1P + H1P * H2P + H2P * HP)     # weights (bf16)
                      + 4 * (H1P + H2P + HP))                        # biases (f32)
    cost = pl.CostEstimate(flops=flops,
                           transcendentals=3 * B_pad * HP,
                           bytes_accessed=bytes_accessed)

    out = pl.pallas_call(
        kernel,
        out_shape=jax.ShapeDtypeStruct((B_pad, HP), jnp.float32),
        grid_spec=pltpu.PrefetchScalarGridSpec(
            num_scalar_prefetch=0,
            grid=grid,
            in_specs=[
                pl.BlockSpec((TILE_B, s_dim), lambda i: (i, 0)),   # x tile
                pl.BlockSpec((s_dim, H1P), lambda i: (0, 0)),      # w1 (resident, bf16)
                pl.BlockSpec((1, H1P), lambda i: (0, 0)),          # b1
                pl.BlockSpec((H1P, H2P), lambda i: (0, 0)),        # w2 (resident, bf16)
                pl.BlockSpec((1, H2P), lambda i: (0, 0)),          # b2
                pl.BlockSpec((H2P, HP), lambda i: (0, 0)),         # fused head W (bf16)
                pl.BlockSpec((1, HP), lambda i: (0, 0)),           # fused head b
            ],
            out_specs=pl.BlockSpec((TILE_B, HP), lambda i: (i, 0)),
        ),
        compiler_params=pltpu.CompilerParams(
            dimension_semantics=("parallel",),
            vmem_limit_bytes=32 * 1024 * 1024),
        cost_estimate=cost,
    )(x, prep["w1"], prep["b1"], prep["w2"], prep["b2"], prep["wh"], prep["bh"])

    D, C = discrete_dim, continuous_dim
    disc = out[:B, :D]
    mu = out[:B, D:D + C]
    sigma = out[:B, D + C:D + 2 * C]
    values = out[:B, D + 2 * C:D + 2 * C + 1]
    return disc, mu, sigma, values


def _init_linear(key, fan_in, fan_out):
    """PyTorch nn.Linear default init: U(-1/sqrt(fan_in), 1/sqrt(fan_in))."""
    kw, kb = jax.random.split(key)
    bound = 1.0 / math.sqrt(fan_in)
    w = jax.random.uniform(kw, (fan_in, fan_out), jnp.float32, -bound, bound)
    b = jax.random.uniform(kb, (1, fan_out), jnp.float32, -bound, bound)
    return w, b


def init_net_params(key, s_dim, discrete_dim, continuous_dim,
                    hidden1_size=400, hidden2_size=300):
    keys = jax.random.split(key, 6)
    w1, b1 = _init_linear(keys[0], s_dim, hidden1_size)
    w2, b2 = _init_linear(keys[1], hidden1_size, hidden2_size)
    wd, bd = _init_linear(keys[2], hidden2_size, discrete_dim)
    wmu, bmu = _init_linear(keys[3], hidden2_size, continuous_dim)
    wsig, bsig = _init_linear(keys[4], hidden2_size, continuous_dim)
    wv, bv = _init_linear(keys[5], hidden2_size, 1)
    return dict(w1=w1, b1=b1, w2=w2, b2=b2, wd=wd, bd=bd,
                wmu=wmu, bmu=bmu, wsig=wsig, bsig=bsig, wv=wv, bv=bv)


def _reference_forward(x, p):
    """Pure-JAX f32 reference (unpadded params) for a correctness check."""
    x = jnp.where(jnp.isnan(x), 0.0, x)
    x = jnp.where(x == jnp.inf, 1.0, x)
    x = jnp.where(x == -jnp.inf, -1.0, x)
    h = jax.nn.relu(x @ p["w1"] + p["b1"])
    h = jax.nn.relu(h @ p["w2"] + p["b2"])
    disc = jnp.clip(jax.nn.sigmoid(h @ p["wd"] + p["bd"]), 0.01, 0.99)
    mu = jnp.tanh(h @ p["wmu"] + p["bmu"])
    sigma = jnp.clip(jax.nn.softplus(h @ p["wsig"] + p["bsig"]) + 0.01, 0.1, 1.0)
    values = h @ p["wv"] + p["bv"]
    return disc, mu, sigma, values


if __name__ == "__main__":
    # Small, forward-consistent shapes
    batch = 2
    s_dim = 32
    discrete_dim = 6
    continuous_dim = 4
    hidden1, hidden2 = 400, 300  # module defaults

    key = jax.random.PRNGKey(0)
    k_x, k_p = jax.random.split(key)
    x = jax.random.normal(k_x, (batch, s_dim), jnp.float32)
    params = init_net_params(k_p, s_dim, discrete_dim, continuous_dim,
                             hidden1, hidden2)

    # one-time weight prep (padding + head fusion + bf16 cast), cached
    prep = prepare_params(params)
    jax.block_until_ready(prep)

    disc_probs, mu, sigma, values = net_forward(
        x, prep, discrete_dim, continuous_dim)
    jax.block_until_ready((disc_probs, mu, sigma, values))

    # sanity check vs pure-JAX f32 reference.  Tolerance covers the bf16
    # matmul operands (~1e-2 relative worst case for this net's magnitudes)
    # plus the EUP approx reciprocal (~2e-4).
    ref = _reference_forward(x, params)
    for got, want in zip((disc_probs, mu, sigma, values), ref):
        assert got.shape == want.shape
        assert jnp.max(jnp.abs(got - want)) < 3e-2

    print("KERNEL_OK")
</pallas_src>

<mosaic_0001>
module attributes {stable_mosaic.version = 11 : i64} {
  func.func @_net_kernel(%arg0: i32, %arg1: memref<8x32xf32, #tpu.memory_space<vmem>>, %arg2: memref<32x512xbf16, #tpu.memory_space<vmem>>, %arg3: memref<1x512xf32, #tpu.memory_space<vmem>>, %arg4: memref<512x384xbf16, #tpu.memory_space<vmem>>, %arg5: memref<1x384xf32, #tpu.memory_space<vmem>>, %arg6: memref<384x128xbf16, #tpu.memory_space<vmem>>, %arg7: memref<1x128xf32, #tpu.memory_space<vmem>>, %arg8: memref<8x128xf32, #tpu.memory_space<vmem>>) attributes {dimension_semantics = [#tpu.dimension_semantics<parallel>], iteration_bounds = array<i64: 1>, scalar_prefetch = 0 : i64, scratch_operands = 0 : i64, tpu.core_type = #tpu.core_type<tc>, window_params = [{transform_indices = @transform_0, window_bounds = array<i64: 8, 32>}, {pipeline_mode = #tpu.pipeline_mode<synchronous>, transform_indices = @transform_1, window_bounds = array<i64: 32, 512>}, {pipeline_mode = #tpu.pipeline_mode<synchronous>, transform_indices = @transform_2, window_bounds = array<i64: 1, 512>}, {pipeline_mode = #tpu.pipeline_mode<synchronous>, transform_indices = @transform_3, window_bounds = array<i64: 512, 384>}, {pipeline_mode = #tpu.pipeline_mode<synchronous>, transform_indices = @transform_4, window_bounds = array<i64: 1, 384>}, {pipeline_mode = #tpu.pipeline_mode<synchronous>, transform_indices = @transform_5, window_bounds = array<i64: 384, 128>}, {pipeline_mode = #tpu.pipeline_mode<synchronous>, transform_indices = @transform_6, window_bounds = array<i64: 1, 128>}, {transform_indices = @transform_7, window_bounds = array<i64: 8, 128>}]} {
    %c0 = arith.constant 0 : index
    %c0_0 = arith.constant 0 : index
    %0 = vector.load %arg1[%c0, %c0_0] : memref<8x32xf32, #tpu.memory_space<vmem>>, vector<8x32xf32>
    %1 = arith.cmpf one, %0, %0 : vector<8x32xf32>
    %cst = arith.constant 0.000000e+00 : f32
    %2 = vector.broadcast %cst : f32 to vector<8x32xf32>
    %3 = arith.select %1, %2, %0 : vector<8x32xi1>, vector<8x32xf32>
    %4 = math.absf %3 : vector<8x32xf32>
    %cst_1 = arith.constant 0x7F800000 : f32
    %5 = vector.broadcast %cst_1 : f32 to vector<8x32xf32>
    %6 = arith.cmpf oeq, %4, %5 : vector<8x32xf32>
    %cst_2 = arith.constant 0.000000e+00 : f32
    %7 = vector.broadcast %cst_2 : f32 to vector<8x32xf32>
    %8 = arith.cmpf ogt, %3, %7 : vector<8x32xf32>
    %cst_3 = arith.constant 1.000000e+00 : f32
    %cst_4 = arith.constant -1.000000e+00 : f32
    %9 = vector.broadcast %cst_3 : f32 to vector<8x32xf32>
    %10 = vector.broadcast %cst_4 : f32 to vector<8x32xf32>
    %11 = arith.select %8, %9, %10 : vector<8x32xi1>, vector<8x32xf32>
    %12 = arith.select %6, %11, %3 : vector<8x32xi1>, vector<8x32xf32>
    %13 = arith.truncf %12 : vector<8x32xf32> to vector<8x32xbf16>
    %c0_5 = arith.constant 0 : index
    %c0_6 = arith.constant 0 : index
    %14 = vector.load %arg2[%c0_5, %c0_6] : memref<32x512xbf16, #tpu.memory_space<vmem>>, vector<32x512xbf16>
    %cst_7 = arith.constant dense<0.000000e+00> : vector<8x512xf32>
    %15 = tpu.matmul %13, %14, %cst_7 {dimension_numbers = #tpu.dot_dimension_numbers<[1], [0], [0], [1], [0, 0, 1, 1], [], []>} : vector<8x32xbf16>, vector<32x512xbf16>, vector<8x512xf32> -> vector<8x512xf32>
    %c0_8 = arith.constant 0 : index
    %c0_9 = arith.constant 0 : index
    %16 = vector.load %arg3[%c0_8, %c0_9] : memref<1x512xf32, #tpu.memory_space<vmem>>, vector<1x512xf32>
    %17 = vector.broadcast %16 : vector<1x512xf32> to vector<8x512xf32>
    %18 = arith.addf %15, %17 : vector<8x512xf32>
    %cst_10 = arith.constant 0.000000e+00 : f32
    %19 = vector.broadcast %cst_10 : f32 to vector<8x512xf32>
    %20 = arith.maximumf %18, %19 : vector<8x512xf32>
    %21 = arith.truncf %20 : vector<8x512xf32> to vector<8x512xbf16>
    %c0_11 = arith.constant 0 : index
    %c0_12 = arith.constant 0 : index
    %22 = vector.load %arg4[%c0_11, %c0_12] : memref<512x384xbf16, #tpu.memory_space<vmem>>, vector<512x384xbf16>
    %cst_13 = arith.constant dense<0.000000e+00> : vector<8x384xf32>
    %23 = tpu.matmul %21, %22, %cst_13 {dimension_numbers = #tpu.dot_dimension_numbers<[1], [0], [0], [1], [0, 0, 1, 1], [], []>} : vector<8x512xbf16>, vector<512x384xbf16>, vector<8x384xf32> -> vector<8x384xf32>
    %c0_14 = arith.constant 0 : index
    %c0_15 = arith.constant 0 : index
    %24 = vector.load %arg5[%c0_14, %c0_15] : memref<1x384xf32, #tpu.memory_space<vmem>>, vector<1x384xf32>
    %25 = vector.broadcast %24 : vector<1x384xf32> to vector<8x384xf32>
    %26 = arith.addf %23, %25 : vector<8x384xf32>
    %cst_16 = arith.constant 0.000000e+00 : f32
    %27 = vector.broadcast %cst_16 : f32 to vector<8x384xf32>
    %28 = arith.maximumf %26, %27 : vector<8x384xf32>
    %29 = arith.truncf %28 : vector<8x384xf32> to vector<8x384xbf16>
    %c0_17 = arith.constant 0 : index
    %c0_18 = arith.constant 0 : index
    %30 = vector.load %arg6[%c0_17, %c0_18] : memref<384x128xbf16, #tpu.memory_space<vmem>>, vector<384x128xbf16>
    %cst_19 = arith.constant dense<0.000000e+00> : vector<8x128xf32>
    %31 = tpu.matmul %29, %30, %cst_19 {dimension_numbers = #tpu.dot_dimension_numbers<[1], [0], [0], [1], [0, 0, 1, 1], [], []>} : vector<8x384xbf16>, vector<384x128xbf16>, vector<8x128xf32> -> vector<8x128xf32>
    %c0_20 = arith.constant 0 : index
    %c0_21 = arith.constant 0 : index
    %32 = vector.load %arg7[%c0_20, %c0_21] : memref<1x128xf32, #tpu.memory_space<vmem>>, vector<1x128xf32>
    %33 = vector.broadcast %32 : vector<1x128xf32> to vector<8x128xf32>
    %34 = arith.addf %31, %33 : vector<8x128xf32>
    %35 = tpu.iota {dimensions = array<i32: 1>} : vector<8x128xi32>
    %c6_i32 = arith.constant 6 : i32
    %36 = vector.broadcast %c6_i32 : i32 to vector<8x128xi32>
    %37 = arith.cmpi sge, %35, %36 : vector<8x128xi32>
    %c10_i32 = arith.constant 10 : i32
    %38 = vector.broadcast %c10_i32 : i32 to vector<8x128xi32>
    %39 = arith.cmpi slt, %35, %38 : vector<8x128xi32>
    %40 = arith.andi %37, %39 : vector<8x128xi1>
    %41 = math.absf %34 : vector<8x128xf32>
    %cst_22 = arith.constant 2.000000e+00 : f32
    %42 = vector.broadcast %cst_22 : f32 to vector<8x128xf32>
    %43 = arith.mulf %42, %41 : vector<8x128xf32>
    %44 = arith.select %40, %43, %41 : vector<8x128xi1>, vector<8x128xf32>
    %cst_23 = arith.constant 0.000000e+00 : f32
    %45 = vector.broadcast %cst_23 : f32 to vector<8x128xf32>
    %46 = arith.subf %45, %44 : vector<8x128xf32>
    %47 = math.exp %46 : vector<8x128xf32>
    %cst_24 = arith.constant 1.000000e+00 : f32
    %48 = vector.broadcast %cst_24 : f32 to vector<8x128xf32>
    %49 = arith.addf %48, %47 : vector<8x128xf32>
    %50 = tpu.reciprocal %49 {approx = true} : vector<8x128xf32> -> vector<8x128xf32>
    %cst_25 = arith.constant 0.000000e+00 : f32
    %51 = vector.broadcast %cst_25 : f32 to vector<8x128xf32>
    %52 = arith.cmpf oge, %34, %51 : vector<8x128xf32>
    %cst_26 = arith.constant 1.000000e+00 : f32
    %53 = vector.broadcast %cst_26 : f32 to vector<8x128xf32>
    %54 = arith.subf %53, %50 : vector<8x128xf32>
    %55 = arith.select %52, %50, %54 : vector<8x128xi1>, vector<8x128xf32>
    %cst_27 = arith.constant 0.00999999977 : f32
    %cst_28 = arith.constant 9.900000e-01 : f32
    %56 = vector.broadcast %cst_27 : f32 to vector<8x128xf32>
    %57 = arith.maximumf %56, %55 : vector<8x128xf32>
    %58 = vector.broadcast %cst_28 : f32 to vector<8x128xf32>
    %59 = arith.minimumf %58, %57 : vector<8x128xf32>
    %cst_29 = arith.constant 2.000000e+00 : f32
    %60 = vector.broadcast %cst_29 : f32 to vector<8x128xf32>
    %61 = arith.mulf %60, %50 : vector<8x128xf32>
    %cst_30 = arith.constant 1.000000e+00 : f32
    %62 = vector.broadcast %cst_30 : f32 to vector<8x128xf32>
    %63 = arith.subf %61, %62 : vector<8x128xf32>
    %cst_31 = arith.constant 2.000000e+00 : f32
    %64 = vector.broadcast %cst_31 : f32 to vector<8x128xf32>
    %65 = arith.mulf %64, %50 : vector<8x128xf32>
    %cst_32 = arith.constant 1.000000e+00 : f32
    %66 = vector.broadcast %cst_32 : f32 to vector<8x128xf32>
    %67 = arith.subf %66, %65 : vector<8x128xf32>
    %68 = arith.select %52, %63, %67 : vector<8x128xi1>, vector<8x128xf32>
    %cst_33 = arith.constant 0.000000e+00 : f32
    %69 = vector.broadcast %cst_33 : f32 to vector<8x128xf32>
    %70 = arith.maximumf %34, %69 : vector<8x128xf32>
    %71 = math.log1p %47 : vector<8x128xf32>
    %72 = arith.addf %70, %71 : vector<8x128xf32>
    %cst_34 = arith.constant 0.00999999977 : f32
    %73 = vector.broadcast %cst_34 : f32 to vector<8x128xf32>
    %74 = arith.addf %72, %73 : vector<8x128xf32>
    %cst_35 = arith.constant 1.000000e-01 : f32
    %cst_36 = arith.constant 1.000000e+00 : f32
    %75 = vector.broadcast %cst_35 : f32 to vector<8x128xf32>
    %76 = arith.maximumf %75, %74 : vector<8x128xf32>
    %77 = vector.broadcast %cst_36 : f32 to vector<8x128xf32>
    %78 = arith.minimumf %77, %76 : vector<8x128xf32>
    %c6_i32_37 = arith.constant 6 : i32
    %79 = vector.broadcast %c6_i32_37 : i32 to vector<8x128xi32>
    %80 = arith.cmpi slt, %35, %79 : vector<8x128xi32>
    %c10_i32_38 = arith.constant 10 : i32
    %81 = vector.broadcast %c10_i32_38 : i32 to vector<8x128xi32>
    %82 = arith.cmpi slt, %35, %81 : vector<8x128xi32>
    %c14_i32 = arith.constant 14 : i32
    %83 = vector.broadcast %c14_i32 : i32 to vector<8x128xi32>
    %84 = arith.cmpi slt, %35, %83 : vector<8x128xi32>
    %85 = arith.select %84, %78, %34 : vector<8x128xi1>, vector<8x128xf32>
    %86 = arith.select %82, %68, %85 : vector<8x128xi1>, vector<8x128xf32>
    %87 = arith.select %80, %59, %86 : vector<8x128xi1>, vector<8x128xf32>
    %c0_39 = arith.constant 0 : index
    %c0_40 = arith.constant 0 : index
    %88 = vector.load %arg8[%c0_39, %c0_40] : memref<8x128xf32, #tpu.memory_space<vmem>>, vector<8x128xf32>
    tpu.vector_store %arg8[%c0_39, %c0_40], %87 {strides = array<i32>} : memref<8x128xf32, #tpu.memory_space<vmem>>, vector<8x128xf32>,
    return
  }
  func.func @transform_0(%arg0: i32) -> (i32, i32) {
    %c0_i32 = arith.constant 0 : i32
    %c0_i32_0 = arith.constant 0 : i32
    return %arg0, %c0_i32 : i32, i32
  }
  func.func @transform_1(%arg0: i32) -> (i32, i32) {
    %c0_i32 = arith.constant 0 : i32
    %c0_i32_0 = arith.constant 0 : i32
    %c0_i32_1 = arith.constant 0 : i32
    return %c0_i32, %c0_i32_0 : i32, i32
  }
  func.func @transform_2(%arg0: i32) -> (i32, i32) {
    %c0_i32 = arith.constant 0 : i32
    %c0_i32_0 = arith.constant 0 : i32
    %c0_i32_1 = arith.constant 0 : i32
    return %c0_i32, %c0_i32_0 : i32, i32
  }
  func.func @transform_3(%arg0: i32) -> (i32, i32) {
    %c0_i32 = arith.constant 0 : i32
    %c0_i32_0 = arith.constant 0 : i32
    %c0_i32_1 = arith.constant 0 : i32
    return %c0_i32, %c0_i32_0 : i32, i32
  }
  func.func @transform_4(%arg0: i32) -> (i32, i32) {
    %c0_i32 = arith.constant 0 : i32
    %c0_i32_0 = arith.constant 0 : i32
    %c0_i32_1 = arith.constant 0 : i32
    return %c0_i32, %c0_i32_0 : i32, i32
  }
  func.func @transform_5(%arg0: i32) -> (i32, i32) {
    %c0_i32 = arith.constant 0 : i32
    %c0_i32_0 = arith.constant 0 : i32
    %c0_i32_1 = arith.constant 0 : i32
    return %c0_i32, %c0_i32_0 : i32, i32
  }
  func.func @transform_6(%arg0: i32) -> (i32, i32) {
    %c0_i32 = arith.constant 0 : i32
    %c0_i32_0 = arith.constant 0 : i32
    %c0_i32_1 = arith.constant 0 : i32
    return %c0_i32, %c0_i32_0 : i32, i32
  }
  func.func @transform_7(%arg0: i32) -> (i32, i32) {
    %c0_i32 = arith.constant 0 : i32
    %c0_i32_0 = arith.constant 0 : i32
    return %arg0, %c0_i32 : i32, i32
  }
}

</mosaic_0001>

<bundles_post_ra>
// kernel: tpu_custom_call.1
= control target key start
LH: loop header
LB: loop body
LE: loop exit
PB: predicated region body
PF: predicated region fallthrough
CT: control target
= control target key end

     0   :  { %12 = vsyncpa [#allocation3], 0  ;;  %s2108_s0 = inlined_call_operand.hbm [shape: f32[8,32], index: 0, kind: input, shape index: {}]   ;;  %s2109_s1 = inlined_call_operand.hbm [shape: bf16[32,512], index: 1, kind: input, shape index: {}]   ;;  %s2110_s2 = inlined_call_operand.vmem [shape: f32[1,512], index: 2, kind: input, shape index: {}]   ;;  %s2111_s3 = inlined_call_operand.hbm [shape: bf16[512,384], index: 3, kind: input, shape index: {}]   ;;  %s2112_s4 = inlined_call_operand.vmem [shape: f32[1,384], index: 4, kind: input, shape index: {}]   ;;  %s2113_s5 = inlined_call_operand.hbm [shape: bf16[384,128], index: 5, kind: input, shape index: {}]   ;;  %s2114_s6 = inlined_call_operand.vmem [shape: f32[1,128], index: 6, kind: input, shape index: {}]   ;;  %s2115_s7 = inlined_call_operand.hbm [shape: f32[8,128], index: 7, kind: output, shape index: {}]  }
   0x1   :  { %13 = vsyncpa [#allocation6], 0 }
   0x2   :  { %14 = vsyncpa [#allocation9], 0 }
   0x3   :  { %15 = vsyncpa [#allocation4], 0  ;;  %s1953_s24 = smov [#allocation5]   ;;  %s1835_s28 = scalar_lea.hbm %s2109_s1, 1024 }
   0x4   :  { %s31_s25 = sshll.u32 %s1953_s24, 4  ;;  %p1836_p0 = scmp.ne.s32.totalorder %s2109_s1, %s1835_s28  ;;  %s32_s25 = int_to_ptr.vmem [resolvable:$true] %s31_s25 }
   0x5   :  { %p1839_p1 = scmp.lt.u32.totalorder %s1835_s28, %s2109_s1 }
   0x7   :  { %p1841_p2 = pnand %p1839_p1, %p1836_p0 }
   0x9   :  { %1844 = shalt.err (!%p1841_p2)
}
   0xa   :  { %s1845_s10 = scalar_lea.vmem %s32_s25, 1024  ;;  %p1850_p4 = scmp.lt.s32.totalorder %s32_s25, %s32_s25 }
   0xb   :  { %p1846_p3 = scmp.ne.s32.totalorder %s32_s25, %s1845_s10  ;;  %p1851_p5 = scmp.lt.s32.totalorder %s1845_s10, %s1845_s10 }
   0xd   :  { %p1852_p6 = por %p1851_p5, %p1850_p4 }
   0xf   :  { %p1853_p7 = pnand %p1852_p6, %p1846_p3 }
  0x11   :  { %1856 = shalt.err (!%p1853_p7)
}
  0x12   :  { %s1954_s11 = smov 256   ;;  %s1955_s12 = smov 16  }
  0x13   :  { %37 = dma.hbm_to_vmem [thread:$0]  %s2109_s1, 1024, %s32_s25, [#allocation6], %s1954_s11, %s1954_s11, %s1955_s12  }
  0x14   :  { %s1956_s15 = smov [#allocation2]   ;;  %s1957_s17 = smov [#allocation7]  }
  0x15   :  { %s22_s16 = sshll.u32 %s1956_s15, 4  ;;  %s45_s18 = sshll.u32 %s1957_s17, 4  ;;  %s23_s16 = int_to_ptr.vmem [resolvable:$true] %s22_s16  ;;  %s46_s18 = int_to_ptr.vmem [resolvable:$true] %s45_s18 }
  0x16   :  { %s1857_s21 = scalar_lea.hbm %s2108_s0, 128 }
  0x17   :  { %p1858_p8 = scmp.ne.s32.totalorder %s2108_s0, %s1857_s21  ;;  %p1861_p9 = scmp.lt.u32.totalorder %s1857_s21, %s2108_s0 }
  0x19   :  { %p1863_p10 = pnand %p1861_p9, %p1858_p8 }
  0x1b   :  { %1866 = shalt.err (!%p1863_p10)
}
  0x1c   :  { %s1867_s1 = scalar_lea.vmem %s23_s16, 128  ;;  %p1872_p12 = scmp.lt.s32.totalorder %s23_s16, %s23_s16 }
  0x1d   :  { %p1868_p11 = scmp.ne.s32.totalorder %s23_s16, %s1867_s1  ;;  %p1873_p13 = scmp.lt.s32.totalorder %s1867_s1, %s1867_s1 }
  0x1f   :  { %p1874_p0 = por %p1873_p13, %p1872_p12 }
  0x21   :  { %p1875_p1 = pnand %p1874_p0, %p1868_p11 }
  0x23   :  { %1878 = shalt.err (!%p1875_p1)
}
  0x24   :  { %25 = dma.hbm_to_vmem [thread:$0]  %s2108_s0, 128, %s23_s16, [#allocation3]  }
  0x25   :  { %s1879_s30 = scalar_lea.hbm %s2111_s3, 12288 }
  0x26   :  { %p1880_p2 = scmp.ne.s32.totalorder %s2111_s3, %s1879_s30  ;;  %p1883_p3 = scmp.lt.u32.totalorder %s1879_s30, %s2111_s3 }
  0x28   :  { %p1885_p4 = pnand %p1883_p3, %p1880_p2 }
  0x2a   :  { %1888 = shalt.err (!%p1885_p4)
}
  0x2b   :  { %s1889_s12 = scalar_lea.vmem %s46_s18, 12288  ;;  %p1894_p6 = scmp.lt.s32.totalorder %s46_s18, %s46_s18 }
  0x2c   :  { %p1890_p5 = scmp.ne.s32.totalorder %s46_s18, %s1889_s12  ;;  %p1895_p7 = scmp.lt.s32.totalorder %s1889_s12, %s1889_s12 }
  0x2e   :  { %p1896_p8 = por %p1895_p7, %p1894_p6 }
  0x30   :  { %p1897_p9 = pnand %p1896_p8, %p1890_p5 }
  0x32   :  { %1900 = shalt.err (!%p1897_p9)
}
  0x33   :  { %s1958_s0 = smov 192   ;;  %s1959_s13 = smov 12  }
  0x34   :  { %51 = dma.hbm_to_vmem [thread:$0]  %s2111_s3, 12288, %s46_s18, [#allocation6], %s1958_s0, %s1958_s0, %s1959_s13  }
  0x35   :  { %s1960_s16 = smov [#allocation8]   ;;  %s1901_s21 = scalar_lea.hbm %s2113_s5, 3072 }
  0x36   :  { %s59_s17 = sshll.u32 %s1960_s16, 4  ;;  %p1902_p10 = scmp.ne.s32.totalorder %s2113_s5, %s1901_s21  ;;  %s60_s17 = int_to_ptr.vmem [resolvable:$true] %s59_s17 }
  0x37   :  { %p1905_p11 = scmp.lt.u32.totalorder %s1901_s21, %s2113_s5 }
  0x39   :  { %p1907_p12 = pnand %p1905_p11, %p1902_p10 }
  0x3b   :  { %1910 = shalt.err (!%p1907_p12)
}
  0x3c   :  { %s1911_s1 = scalar_lea.vmem %s60_s17, 3072  ;;  %p1916_p0 = scmp.lt.s32.totalorder %s60_s17, %s60_s17 }
  0x3d   :  { %p1912_p13 = scmp.ne.s32.totalorder %s60_s17, %s1911_s1  ;;  %p1917_p1 = scmp.lt.s32.totalorder %s1911_s1, %s1911_s1 }
  0x3f   :  { %p1918_p2 = por %p1917_p1, %p1916_p0 }
  0x41   :  { %p1919_p3 = pnand %p1918_p2, %p1912_p13 }
  0x43   :  { %1922 = shalt.err (!%p1919_p3)
}
  0x44   :  { %s1961_s3 = smov 64   ;;  %s1962_s18 = smov 4  }
  0x45   :  { %65 = dma.hbm_to_vmem [thread:$0]  %s2113_s5, 3072, %s60_s17, [#allocation9], %s1961_s3, %s1961_s3, %s1962_s18  }
  0x46   :  { %1945 = dma.done.wait [#allocation3], 128  }
  0x47   :  { %1946 = vsyncadd [#allocation3], 4294967168 }
  0x48   :  { %1947 = dma.done.wait [#allocation6], 13312  }
  0x49   :  { %1948 = vsyncadd [#allocation6], 4294953984 }
  0x4a   :  { %1949 = dma.done.wait [#allocation9], 3072  }
  0x4b   :  { %1950 = vsyncadd [#allocation9], 4294964224  ;;  %v1963_v0 = vmov 0   ;;  %v1665_v1 = vld [vmem:[#allocation5 + $0x4] ss:$16 sps:$4 sm:$0xff]   ;;  %v81_v5 = vld [vmem:[#allocation2] sm:$0xff] }
  0x4c   :  { %196 = vmatprep.mubr.bf16.mxu0 %v1963_v0  ;;  %237 = vmatprep.mubr.bf16.mxu1 %v1963_v0  ;;  %v1667_v2 = vld [vmem:[#allocation5] ss:$16 sps:$4 sm:$0xff]   ;;  %v1668_v3 = vld [vmem:[#allocation5 + $0x24] ss:$16 sps:$4 sm:$0xff]   ;;  %vm82_vm0 = vcmp.ne.f32.partialorder %v81_v5, %v81_v5  ;;  %v1671_v6 = vld [vmem:[#allocation5 + $0xc] ss:$16 sps:$4 sm:$0xff]  }
  0x4d   :  { %164 = vmatprep.subr.bf16.mxu0 %v1665_v1  ;;  %v1670_v4 = vld [vmem:[#allocation5 + $0x20] ss:$16 sps:$4 sm:$0xff]   ;;  %v83_v7 = vsel %vm82_vm0, 0.0, %v81_v5  ;;  %v1673_v8 = vld [vmem:[#allocation5 + $0x8] ss:$16 sps:$4 sm:$0xff]   ;;  %205 = vmatprep.subr.bf16.mxu1 %v1671_v6  ;;  %v1964_v11 = vmov -1.0  }
  0x4e   :  { %165 = vmatpush1.bf16.msra.mxu0 %v1667_v2  ;;  %v84_v9 = vand.u32 2147483647, %v83_v7  ;;  %vm86_vm1 = vcmp.gt.f32.partialorder %v83_v7, 0.0  ;;  %v1674_v10 = vld [vmem:[#allocation5 + $0x2c] ss:$16 sps:$4 sm:$0xff]   ;;  %206 = vmatpush1.bf16.msra.mxu1 %v1673_v8  ;;  %vm160_vm3 = vcmask 261120   ;;  %v100_v2 = vlaneseq }
  0x4f   :  { %166 = vmatprep.subr.bf16.mxu0 %v1668_v3  ;;  %v87_v12 = vsel %vm86_vm1, 1.0, %v1964_v11  ;;  %v1676_v13 = vld [vmem:[#allocation5 + $0x28] ss:$16 sps:$4 sm:$0xff]   ;;  %207 = vmatprep.subr.bf16.mxu1 %v1674_v10  ;;  %v1679_v14 = vld [vmem:[#allocation7 + $0x4] ss:$12 sps:$4 sm:$0xff]   ;;  %vm1966_vm4 = vmmov 0  }
  0x50   :  { %vm85_vm2 = vcmp.eq.f32.partialorder %v84_v9, inf  ;;  %v1677_v16 = vld [vmem:[#allocation7] ss:$12 sps:$4 sm:$0xff]   ;;  %v1682_v18 = vld [vmem:[#allocation7 + $0x1c] ss:$12 sps:$4 sm:$0xff]   ;;  %v2057_v3 = vshrl.u32 %v100_v2, 7 }
  0x51   :  { %v88_v15 = vsel %vm85_vm2, %v87_v12, %v83_v7  ;;  %v1680_v19 = vld [vmem:[#allocation7 + $0x18] ss:$12 sps:$4 sm:$0xff]   ;;  %v1685_v20 = vld [vmem:[#allocation7 + $0x34] ss:$12 sps:$4 sm:$0xff]   ;;  %v1683_v21 = vld [vmem:[#allocation7 + $0x30] ss:$12 sps:$4 sm:$0xff]  }
  0x52   :  { %167 = vmatpush1.bf16.msra.mxu0 %v1670_v4  ;;  %v89_v17 = vpack.c.bf16 %v88_v15, %v88_v15  ;;  %208 = vmatpush1.bf16.msra.mxu1 %v1676_v13  ;;  %v1688_v22 = vld [vmem:[#allocation7 + $0x4c] ss:$12 sps:$4 sm:$0xff]   ;;  %v1704_v23 = vld [vmem:[#allocation7 + $0xc8] ss:$12 sps:$4 sm:$0xff]   ;;  %v1691_v26 = vld [vmem:[#allocation7 + $0x64] ss:$12 sps:$4 sm:$0xff]  }
  0x53   :  { %911 = vmatprep.subr.bf16.mxu0 %v1679_v14  ;;  %v1705_v24 = vld [vmem:[#allocation7 + $0x8] ss:$12 sps:$4 sm:$0xff]   ;;  %1549 = vmatprep.subr.bf16.mxu1 %v1704_v23  ;;  %v1709_v27 = vld [vmem:[#allocation7 + $0xe0] ss:$12 sps:$4 sm:$0xff]   ;;  %v1714_v31 = vld [vmem:[#allocation7 + $0xf8] ss:$12 sps:$4 sm:$0xff]  }
  0x54   :  { %v1686_v25 = vld [vmem:[#allocation7 + $0x48] ss:$12 sps:$4 sm:$0xff]   ;;  %v1710_v28 = vld [vmem:[#allocation7 + $0x20] ss:$12 sps:$4 sm:$0xff]   ;;  %v1715_v32 = vld [vmem:[#allocation7 + $0x38] ss:$12 sps:$4 sm:$0xff]  }
  0x55   :  { %1425 = vmatmul.mubr.msk.bf16.vlgmr.msra.gmra.mrb[0].mxu0 %vm160_vm3, %v89_v17  ;;  %1426 = vmatmul.mubr.msk.bf16.vlgmr.msra.gmra.mrb[0].mxu1 %vm160_vm3, %v89_v17  ;;  %v1689_v29 = vld [vmem:[#allocation7 + $0x60] ss:$12 sps:$4 sm:$0xff]   ;;  %v1694_v30 = vld [vmem:[#allocation7 + $0x7c] ss:$12 sps:$4 sm:$0xff]   ;;  %v1692_v33 = vld [vmem:[#allocation7 + $0x78] ss:$12 sps:$4 sm:$0xff]  }
  0x56   :  { %912 = vmatpush1.bf16.msra.mxu0 %v1677_v16  ;;  %1550 = vmatpush3.bf16.msra.mxu1 %v1705_v24  ;;  %v1697_v34 = vld [vmem:[#allocation7 + $0x94] ss:$12 sps:$4 sm:$0xff]   ;;  %v1719_v35 = vld [vmem:[#allocation7 + $0x110] ss:$12 sps:$4 sm:$0xff]   ;;  %v1700_v38 = vld [vmem:[#allocation7 + $0xac] ss:$12 sps:$4 sm:$0xff]  }
  0x57   :  { %913 = vmatprep.subr.bf16.mxu0 %v1682_v18  ;;  %1551 = vmatprep.subr.bf16.mxu1 %v1709_v27  ;;  %v1720_v36 = vld [vmem:[#allocation7 + $0x50] ss:$12 sps:$4 sm:$0xff]   ;;  %v1724_v39 = vld [vmem:[#allocation7 + $0x128] ss:$12 sps:$4 sm:$0xff]   ;;  %v1729_v42 = vld [vmem:[#allocation7 + $0x140] ss:$12 sps:$4 sm:$0xff]  }
  0x58   :  { %v1695_v37 = vld [vmem:[#allocation7 + $0x90] ss:$12 sps:$4 sm:$0xff]   ;;  %v1725_v40 = vld [vmem:[#allocation7 + $0x68] ss:$12 sps:$4 sm:$0xff]   ;;  %v1730_v44 = vld [vmem:[#allocation7 + $0x80] ss:$12 sps:$4 sm:$0xff]  }
  0x59   :  { %v1698_v41 = vld [vmem:[#allocation7 + $0xa8] ss:$12 sps:$4 sm:$0xff]   ;;  %v1703_v43 = vld [vmem:[#allocation7 + $0xc4] ss:$12 sps:$4 sm:$0xff]   ;;  %v1701_v45 = vld [vmem:[#allocation7 + $0xc0] ss:$12 sps:$4 sm:$0xff]  }
  0x5a   :  { %914 = vmatpush1.bf16.msra.mxu0 %v1680_v19  ;;  %1552 = vmatpush3.bf16.msra.mxu1 %v1710_v28  ;;  %v1708_v46 = vld [vmem:[#allocation7 + $0xdc] ss:$12 sps:$4 sm:$0xff]   ;;  %v1706_v47 = vld [vmem:[#allocation7 + $0xd8] ss:$12 sps:$4 sm:$0xff]   ;;  %v1713_v48 = vld [vmem:[#allocation7 + $0xf4] ss:$12 sps:$4 sm:$0xff]  }
  0x5b   :  { %915 = vmatprep.subr.bf16.mxu0 %v1685_v20  ;;  %1553 = vmatprep.subr.bf16.mxu1 %v1714_v31  ;;  %v1711_v49 = vld [vmem:[#allocation7 + $0xf0] ss:$12 sps:$4 sm:$0xff]   ;;  %v1718_v50 = vld [vmem:[#allocation7 + $0x10c] ss:$12 sps:$4 sm:$0xff]   ;;  %v1716_v51 = vld [vmem:[#allocation7 + $0x108] ss:$12 sps:$4 sm:$0xff]  }
  0x5c   :  { %v1723_v52 = vld [vmem:[#allocation7 + $0x124] ss:$12 sps:$4 sm:$0xff]   ;;  %v1721_v53 = vld [vmem:[#allocation7 + $0x120] ss:$12 sps:$4 sm:$0xff]   ;;  %v1728_v54 = vld [vmem:[#allocation7 + $0x13c] ss:$12 sps:$4 sm:$0xff]  }
  0x5d   :  { %v1726_v55 = vld [vmem:[#allocation7 + $0x138] ss:$12 sps:$4 sm:$0xff]   ;;  %v1733_v56 = vld [vmem:[#allocation7 + $0x154] ss:$12 sps:$4 sm:$0xff]   ;;  %v1731_v58 = vld [vmem:[#allocation7 + $0x150] ss:$12 sps:$4 sm:$0xff]  }
  0x5e   :  { %916 = vmatpush1.bf16.msra.mxu0 %v1683_v21  ;;  %1554 = vmatpush3.bf16.msra.mxu1 %v1715_v32  ;;  %v1734_v57 = vld [vmem:[#allocation7 + $0x158] ss:$12 sps:$4 sm:$0xff]   ;;  %v1739_v61 = vld [vmem:[#allocation7 + $0x170] ss:$12 sps:$4 sm:$0xff]   ;;  %v1736_v62 = vld [vmem:[#allocation7 + $0x168] ss:$12 sps:$4 sm:$0xff]  }
  0x5f   :  { %917 = vmatprep.subr.bf16.mxu0 %v1688_v22  ;;  %1555 = vmatprep.subr.bf16.mxu1 %v1719_v35  ;;  %v1735_v59 = vld [vmem:[#allocation7 + $0x98] ss:$12 sps:$4 sm:$0xff]   ;;  %v1740_v63 = vld [vmem:[#allocation7 + $0xb0] ss:$12 sps:$4 sm:$0xff]   ;;  %v1744_v1 = vld [vmem:[#allocation7 + $0x248] ss:$12 sps:$4 sm:$0xff]  }
  0x60   :  { %v1738_v60 = vld [vmem:[#allocation7 + $0x16c] ss:$12 sps:$4 sm:$0xff]   ;;  %v1743_v0 = vld [vmem:[#allocation7 + $0x184] ss:$12 sps:$4 sm:$0xff]   ;;  %v102_v4 = vsub.s32 0, %v2057_v3  ;;  %v106_v6 = vsub.s32 1, %v2057_v3 }
  0x61   :  { %v2063_v5 = vld [vmem:[%s2110_s2] sm:$0xf]  ;;  %v114_v7 = vsub.s32 3, %v2057_v3 }
  0x62   :  { %918 = vmatpush1.bf16.msra.mxu0 %v1686_v25  ;;  %1556 = vmatpush3.bf16.msra.mxu1 %v1720_v36  ;;  %v103_v8 = vrot.slane %v2063_v5, %v102_v4  ;;  %v107_v9 = vrot.slane %v2063_v5, %v106_v6  ;;  %v1741_v25 = vld [vmem:[#allocation7 + $0x180] ss:$12 sps:$4 sm:$0xff]   ;;  %v1746_v32 = vld [vmem:[#allocation7 + $0x198] ss:$12 sps:$4 sm:$0xff]   ;;  %v1751_v36 = vld [vmem:[#allocation7 + $0x1b0] ss:$12 sps:$4 sm:$0xff]  }
  0x63   :  { %919 = vmatprep.subr.bf16.mxu0 %v1691_v26  ;;  %1557 = vmatprep.subr.bf16.mxu1 %v1724_v39  ;;  %v115_v11 = vrot.slane %v2063_v5, %v114_v7  ;;  %v1745_v26 = vld [vmem:[#allocation7 + $0x188] ss:$12 sps:$4 sm:$0xff]   ;;  %v1754_v35 = vld [vmem:[#allocation7 + $0x278] ss:$12 sps:$4 sm:$0xff]   ;;  %v1759_v39 = vld [vmem:[#allocation7 + $0x290] ss:$12 sps:$4 sm:$0xff]  }
  0x64   :  { %v1789_v7 = vld [vmem:[#allocation7 + $0x274] ss:$12 sps:$4 sm:$0xff]  }
  0x66   :  { %920 = vmatpush1.bf16.msra.mxu0 %v1689_v29  ;;  %1558 = vmatpush3.bf16.msra.mxu1 %v1725_v40  ;;  %v1748_v29 = vld [vmem:[#allocation7 + $0x19c] ss:$12 sps:$4 sm:$0xff]  }
  0x67   :  { %921 = vmatprep.subr.bf16.mxu0 %v1694_v30  ;;  %1559 = vmatprep.subr.bf16.mxu1 %v1729_v42  ;;  %v1749_v30 = vld [vmem:[#allocation7 + $0x260] ss:$12 sps:$4 sm:$0xff]   ;;  %v1756_v40 = vld [vmem:[#allocation7 + $0x1c8] ss:$12 sps:$4 sm:$0xff]   ;;  %v1763_v42 = vld [vmem:[#allocation7 + $0x1e4] ss:$12 sps:$4 sm:$0xff]  }
  0x6a   :  { %922 = vmatpush1.bf16.msra.mxu0 %v1692_v33  ;;  %1560 = vmatpush3.bf16.msra.mxu1 %v1730_v44  ;;  %v1750_v33 = vld [vmem:[#allocation7 + $0x1a0] ss:$12 sps:$4 sm:$0xff]   ;;  %v110_v44 = vsub.s32 2, %v2057_v3  ;;  %v1823_v3 = vld [vmem:[#allocation8 + $0x90] sm:$0xff]  }
  0x6b   :  { %923 = vmatprep.subr.bf16.mxu0 %v1697_v34  ;;  %1561 = vmatprep.subr.bf16.mxu1 %v1734_v57  ;;  %v1753_v34 = vld [vmem:[#allocation7 + $0x1b4] ss:$12 sps:$4 sm:$0xff]   ;;  %v1778_v57 = vld [vmem:[#allocation7 + $0x22c] ss:$12 sps:$4 sm:$0xff]  }
  0x6e   :  { %924 = vmatpush1.bf16.msra.mxu0 %v1695_v37  ;;  %1562 = vmatpush3.bf16.msra.mxu1 %v1735_v59  ;;  %v1755_v37 = vld [vmem:[#allocation7 + $0x1b8] ss:$12 sps:$4 sm:$0xff]  }
  0x6f   :  { %925 = vmatprep.subr.bf16.mxu0 %v1700_v38  ;;  %1563 = vmatprep.subr.bf16.mxu1 %v1739_v61  ;;  %v1758_v38 = vld [vmem:[#allocation7 + $0x1cc] ss:$12 sps:$4 sm:$0xff]   ;;  %v1780_v61 = vld [vmem:[#allocation7 + $0x230] ss:$12 sps:$4 sm:$0xff]  }
  0x72   :  { %926 = vmatpush1.bf16.msra.mxu0 %v1698_v41  ;;  %1564 = vmatpush3.bf16.msra.mxu1 %v1740_v63  ;;  %v1760_v41 = vld [vmem:[#allocation7 + $0x1d0] ss:$12 sps:$4 sm:$0xff]  }
  0x73   :  { %927 = vmatprep.subr.bf16.mxu0 %v1703_v43  ;;  %1571 = vmatprep.subr.bf16.mxu1 %v1744_v1  ;;  %v1764_v43 = vld [vmem:[#allocation7 + $0x2a8] ss:$12 sps:$4 sm:$0xff]  }
  0x74   :  { %v1786_v1 = vld [vmem:[#allocation7 + $0x25c] ss:$12 sps:$4 sm:$0xff]  }
  0x76   :  { %928 = vmatpush1.bf16.msra.mxu0 %v1701_v45  ;;  %v1761_v45 = vld [vmem:[#allocation7 + $0x1e0] ss:$12 sps:$4 sm:$0xff]  }
  0x77   :  { %929 = vmatprep.subr.bf16.mxu0 %v1708_v46  ;;  %v1765_v46 = vld [vmem:[#allocation7 + $0x1e8] ss:$12 sps:$4 sm:$0xff]  }
  0x7a   :  { %930 = vmatpush1.bf16.msra.mxu0 %v1706_v47  ;;  %v1768_v47 = vld [vmem:[#allocation7 + $0x1fc] ss:$12 sps:$4 sm:$0xff]  }
  0x7b   :  { %931 = vmatprep.subr.bf16.mxu0 %v1713_v48  ;;  %v1769_v48 = vld [vmem:[#allocation7 + $0x2c0] ss:$12 sps:$4 sm:$0xff]  }
  0x7e   :  { %932 = vmatpush1.bf16.msra.mxu0 %v1711_v49  ;;  %v111_v49 = vrot.slane %v2063_v5, %v110_v44  ;;  %v1784_v5 = vld [vmem:[#allocation7 + $0x258] ss:$12 sps:$4 sm:$0xff]  }
  0x7f   :  { %933 = vmatprep.subr.bf16.mxu0 %v1718_v50  ;;  %v1766_v50 = vld [vmem:[#allocation7 + $0x1f8] ss:$12 sps:$4 sm:$0xff]  }
  0x82   :  { %934 = vmatpush1.bf16.msra.mxu0 %v1716_v51  ;;  %v1770_v51 = vld [vmem:[#allocation7 + $0x200] ss:$12 sps:$4 sm:$0xff]  }
  0x83   :  { %935 = vmatprep.subr.bf16.mxu0 %v1723_v52  ;;  %v1773_v52 = vld [vmem:[#allocation7 + $0x214] ss:$12 sps:$4 sm:$0xff]  }
  0x86   :  { %936 = vmatpush1.bf16.msra.mxu0 %v1721_v53  ;;  %v1774_v53 = vld [vmem:[#allocation7 + $0x2d8] ss:$12 sps:$4 sm:$0xff]  }
  0x87   :  { %937 = vmatprep.subr.bf16.mxu0 %v1728_v54 }
  0x8a   :  { %938 = vmatpush1.bf16.msra.mxu0 %v1726_v55  ;;  %v1771_v55 = vld [vmem:[#allocation7 + $0x210] ss:$12 sps:$4 sm:$0xff]  }
  0x8b   :  { %939 = vmatprep.subr.bf16.mxu0 %v1733_v56  ;;  %v1775_v56 = vld [vmem:[#allocation7 + $0x218] ss:$12 sps:$4 sm:$0xff]  }
  0x8e   :  { %940 = vmatpush1.bf16.msra.mxu0 %v1731_v58  ;;  %v1779_v58 = vld [vmem:[#allocation7 + $0x2f0] ss:$12 sps:$4 sm:$0xff]  }
  0x8f   :  { %941 = vmatprep.subr.bf16.mxu0 %v1738_v60  ;;  %v1776_v60 = vld [vmem:[#allocation7 + $0x228] ss:$12 sps:$4 sm:$0xff]  }
  0x92   :  { %942 = vmatpush1.bf16.msra.mxu0 %v1736_v62  ;;  %v1783_v62 = vld [vmem:[#allocation7 + $0x244] ss:$12 sps:$4 sm:$0xff]  }
  0x93   :  { %952 = vmatprep.subr.bf16.mxu0 %v1743_v0  ;;  %v1781_v0 = vld [vmem:[#allocation7 + $0x240] ss:$12 sps:$4 sm:$0xff]  }
 0x128   :  { %v198_v10 = vpop.f32.mrb[0].mxu0  ;;  %v2074_v16 = vpop.f32.mrb[0].mxu1 }
 0x129   :  { %v199_v12 = vadd.f32 %v198_v10, %v103_v8  ;;  %v200_v13 = vpop.f32.mrb[1].mxu0  ;;  %v241_v19 = vpop.f32.mrb[1].mxu1  ;;  %v240_v54 = vadd.f32 %v2074_v16, %v111_v49  ;;  %v1787_v8 = vld [vmem:[#allocation7 + $0x270] ss:$12 sps:$4 sm:$0xff]   ;;  %v1790_v10 = vld [vmem:[#allocation7 + $0x288] ss:$12 sps:$4 sm:$0xff]  }
 0x12a   :  { %v201_v14 = vadd.f32 %v200_v13, %v107_v9  ;;  %v202_v15 = vpop.f32.mrb[2].mxu0  ;;  %v242_v21 = vadd.f32 %v241_v19, %v115_v11  ;;  %v243_v22 = vpop.f32.mrb[2].mxu1  ;;  %v1792_v9 = vld [vmem:[#allocation7 + $0x28c] ss:$12 sps:$4 sm:$0xff]   ;;  %v1795_v11 = vld [vmem:[#allocation7 + $0x2a4] ss:$12 sps:$4 sm:$0xff]  }
 0x12b   :  { %v246_v17 = vmax.f32 %v199_v12, 0.0  ;;  %v203_v18 = vpop.f32.mrb[3].mxu0  ;;  %v244_v23 = vpop.f32.mrb[3].mxu1  ;;  %v248_v59 = vmax.f32 %v240_v54, 0.0  ;;  %v1793_v12 = vld [vmem:[#allocation7 + $0x2a0] ss:$12 sps:$4 sm:$0xff]  }
 0x12c   :  { %v247_v20 = vmax.f32 %v201_v14, 0.0  ;;  %v249_v27 = vmax.f32 %v242_v21, 0.0  ;;  %v1798_v13 = vld [vmem:[#allocation7 + $0x2bc] ss:$12 sps:$4 sm:$0xff]   ;;  %v1796_v14 = vld [vmem:[#allocation7 + $0x2b8] ss:$12 sps:$4 sm:$0xff]  }
 0x12d   :  { %v250_v28 = vpack.c.bf16 %v246_v17, %v246_v17  ;;  %v252_v63 = vpack.c.bf16 %v248_v59, %v248_v59  ;;  %v1801_v15 = vld [vmem:[#allocation7 + $0x2d4] ss:$12 sps:$4 sm:$0xff]   ;;  %v1799_v16 = vld [vmem:[#allocation7 + $0x2d0] ss:$12 sps:$4 sm:$0xff]   ;;  %v1804_v17 = vld [vmem:[#allocation7 + $0x2ec] ss:$12 sps:$4 sm:$0xff]  }
 0x12e   :  { %v251_v24 = vpack.c.bf16 %v247_v20, %v247_v20  ;;  %v253_v31 = vpack.c.bf16 %v249_v27, %v249_v27  ;;  %v1802_v18 = vld [vmem:[#allocation7 + $0x2e8] ss:$12 sps:$4 sm:$0xff]   ;;  %v1805_v19 = vld [vmem:[#allocation8 + $0x40] sm:$0xff]  }
 0x12f   :  { %v1806_v20 = vld [vmem:[#allocation8] sm:$0xff]   ;;  %v1807_v21 = vld [vmem:[#allocation8 + $0x48] sm:$0xff]   ;;  %v1809_v23 = vld [vmem:[#allocation8 + $0x50] sm:$0xff]  }
 0x130   :  { %943 = vmatprep.mubr.bf16.mxu0 %v251_v24  ;;  %1025 = vmatprep.mubr.bf16.mxu1 %v251_v24  ;;  %v1808_v22 = vld [vmem:[#allocation8 + $0x8] sm:$0xff]   ;;  %v1810_v24 = vld [vmem:[#allocation8 + $0x10] sm:$0xff]   ;;  %v1813_v27 = vld [vmem:[#allocation8 + $0x60] sm:$0xff]  }
 0x131   :  { %944 = vmatmul.mubr.bf16.vlgmr.msra.gmra.mrb[4].mxu0 %v250_v28  ;;  %1026 = vmatmul.mubr.bf16.vlgmr.msra.gmra.mrb[4].mxu1 %v250_v28  ;;  %v1814_v28 = vld [vmem:[#allocation8 + $0x20] sm:$0xff]  }
 0x132   :  { %953 = vmatpush1.bf16.msra.mxu0 %v1741_v25  ;;  %1572 = vmatpush3.bf16.msra.mxu1 %v1745_v26  ;;  %v1811_v25 = vld [vmem:[#allocation8 + $0x58] sm:$0xff]  }
 0x133   :  { %954 = vmatprep.subr.bf16.mxu0 %v1748_v29  ;;  %1573 = vmatprep.subr.bf16.mxu1 %v1749_v30  ;;  %v1812_v26 = vld [vmem:[#allocation8 + $0x18] sm:$0xff]   ;;  %v1815_v29 = vld [vmem:[#allocation8 + $0x68] sm:$0xff]  }
 0x134   :  { %1065 = vmatprep.mubr.bf16.mxu1 %v253_v31  ;;  %984 = vmatprep.mubr.bf16.mxu0 %v253_v31  ;;  %v1816_v30 = vld [vmem:[#allocation8 + $0x28] sm:$0xff]   ;;  %v1817_v31 = vld [vmem:[#allocation8 + $0x70] sm:$0xff]  }
 0x136   :  { %955 = vmatpush1.bf16.msra.mxu0 %v1746_v32  ;;  %1574 = vmatpush3.bf16.msra.mxu1 %v1750_v33  ;;  %v1818_v32 = vld [vmem:[#allocation8 + $0x30] sm:$0xff]   ;;  %v1819_v33 = vld [vmem:[#allocation8 + $0x78] sm:$0xff]  }
 0x137   :  { %956 = vmatprep.subr.bf16.mxu0 %v1753_v34  ;;  %1575 = vmatprep.subr.bf16.mxu1 %v1754_v35  ;;  %v1820_v34 = vld [vmem:[#allocation8 + $0x38] sm:$0xff]   ;;  %v1965_v35 = vmov 0.0  }
 0x13a   :  { %957 = vmatpush1.bf16.msra.mxu0 %v1751_v36  ;;  %1576 = vmatpush3.bf16.msra.mxu1 %v1755_v37 }
 0x13b   :  { %958 = vmatprep.subr.bf16.mxu0 %v1758_v38  ;;  %1577 = vmatprep.subr.bf16.mxu1 %v1759_v39 }
 0x13e   :  { %959 = vmatpush1.bf16.msra.mxu0 %v1756_v40  ;;  %1578 = vmatpush3.bf16.msra.mxu1 %v1760_v41  ;;  %v382_v41 = vld [vmem:[%s2112_s4] sm:$0x7] }
 0x13f   :  { %960 = vmatprep.subr.bf16.mxu0 %v1763_v42  ;;  %1579 = vmatprep.subr.bf16.mxu1 %v1764_v43  ;;  %v395_v42 = vrot.slane %v382_v41, %v110_v44 }
 0x142   :  { %961 = vmatpush1.bf16.msra.mxu0 %v1761_v45  ;;  %1580 = vmatpush3.bf16.msra.mxu1 %v1765_v46 }
 0x143   :  { %962 = vmatprep.subr.bf16.mxu0 %v1768_v47  ;;  %1581 = vmatprep.subr.bf16.mxu1 %v1769_v48 }
 0x146   :  { %963 = vmatpush1.bf16.msra.mxu0 %v1766_v50  ;;  %1582 = vmatpush3.bf16.msra.mxu1 %v1770_v51  ;;  %v387_v51 = vrot.slane %v382_v41, %v102_v4  ;;  %v1824_v4 = vld [vmem:[#allocation8 + $0x98] sm:$0xff]  }
 0x147   :  { %964 = vmatprep.subr.bf16.mxu0 %v1773_v52  ;;  %1583 = vmatprep.subr.bf16.mxu1 %v1774_v53  ;;  %v391_v52 = vrot.slane %v382_v41, %v106_v6  ;;  %v1825_v6 = vld [vmem:[#allocation8 + $0xa0] sm:$0xff]  }
 0x14a   :  { %965 = vmatpush1.bf16.msra.mxu0 %v1771_v55  ;;  %1584 = vmatpush3.bf16.msra.mxu1 %v1775_v56 }
 0x14b   :  { %966 = vmatprep.subr.bf16.mxu0 %v1778_v57  ;;  %1585 = vmatprep.subr.bf16.mxu1 %v1779_v58 }
 0x14e   :  { %967 = vmatpush1.bf16.msra.mxu0 %v1776_v60  ;;  %1586 = vmatpush3.bf16.msra.mxu1 %v1780_v61  ;;  %v1821_v61 = vld [vmem:[#allocation8 + $0x80] sm:$0xff]  }
 0x14f   :  { %968 = vmatprep.subr.bf16.mxu0 %v1783_v62  ;;  %1593 = vmatprep.subr.bf16.mxu1 %v1805_v19 }
 0x151   :  { %1066 = vmatmul.mubr.bf16.vlgmr.msra.gmra.mrb[8].mxu1 %v252_v63 }
 0x152   :  { %969 = vmatpush1.bf16.msra.mxu0 %v1781_v0  ;;  %1594 = vmatpush3.bf16.msra.mxu1 %v1806_v20  ;;  %v1826_v0 = vld [vmem:[#allocation8 + $0xa8] sm:$0xff]  }
 0x153   :  { %970 = vmatprep.subr.bf16.mxu0 %v1786_v1  ;;  %1595 = vmatprep.subr.bf16.mxu1 %v1807_v21  ;;  %v1827_v1 = vld [vmem:[#allocation8 + $0xb0] sm:$0xff]  }
 0x156   :  { %971 = vmatpush1.bf16.msra.mxu0 %v1784_v5  ;;  %1596 = vmatpush3.bf16.msra.mxu1 %v1808_v22  ;;  %v1828_v5 = vld [vmem:[#allocation8 + $0xb8] sm:$0xff]  }
 0x157   :  { %972 = vmatprep.subr.bf16.mxu0 %v1789_v7  ;;  %1597 = vmatprep.subr.bf16.mxu1 %v1809_v23 }
 0x15a   :  { %973 = vmatpush1.bf16.msra.mxu0 %v1787_v8  ;;  %1598 = vmatpush3.bf16.msra.mxu1 %v1810_v24 }
 0x15b   :  { %974 = vmatprep.subr.bf16.mxu0 %v1792_v9  ;;  %1599 = vmatprep.subr.bf16.mxu1 %v1811_v25 }
 0x15e   :  { %975 = vmatpush1.bf16.msra.mxu0 %v1790_v10  ;;  %1600 = vmatpush3.bf16.msra.mxu1 %v1812_v26 }
 0x15f   :  { %976 = vmatprep.subr.bf16.mxu0 %v1795_v11  ;;  %1601 = vmatprep.subr.bf16.mxu1 %v1813_v27 }
 0x162   :  { %977 = vmatpush1.bf16.msra.mxu0 %v1793_v12  ;;  %1602 = vmatpush3.bf16.msra.mxu1 %v1814_v28 }
 0x163   :  { %978 = vmatprep.subr.bf16.mxu0 %v1798_v13  ;;  %1603 = vmatprep.subr.bf16.mxu1 %v1815_v29 }
 0x166   :  { %979 = vmatpush1.bf16.msra.mxu0 %v1796_v14  ;;  %1604 = vmatpush3.bf16.msra.mxu1 %v1816_v30  ;;  %v1523_v14 = vld [vmem:[%s2114_s6] ss:$0 sm:$0xff]  ;;  %s1967_s6 = smov [#allocation10]  }
 0x167   :  { %980 = vmatprep.subr.bf16.mxu0 %v1801_v15  ;;  %1605 = vmatprep.subr.bf16.mxu1 %v1817_v31  ;;  %v1359_v15 = vand.u32 127, %v100_v2  ;;  %s1406_s8 = sshll.u32 %s1967_s6, 4  ;;  %s1407_s8 = int_to_ptr.vmem [resolvable:$true] %s1406_s8 }
 0x168   :  { %s1923_s9 = scalar_lea.vmem %s1407_s8, 128  ;;  %p1928_p5 = scmp.lt.s32.totalorder %s1407_s8, %s1407_s8 }
 0x169   :  { %vm1360_vm5 = vcmp.ge.s32.totalorder %v1359_v15, 6  ;;  %vm1361_vm6 = vcmp.lt.s32.totalorder %v1359_v15, 10  ;;  %vm1395_vm10 = vcmp.lt.s32.totalorder %v1359_v15, 14  ;;  %vm1394_vm11 = vcmp.lt.s32.totalorder %v1359_v15, 6  ;;  %p1924_p4 = scmp.ne.s32.totalorder %s1407_s8, %s1923_s9  ;;  %p1929_p6 = scmp.lt.s32.totalorder %s1923_s9, %s1923_s9 }
 0x16a   :  { %981 = vmatpush1.bf16.msra.mxu0 %v1799_v16  ;;  %1606 = vmatpush3.bf16.msra.mxu1 %v1818_v32  ;;  %vm1362_vm7 = vmand %vm1360_vm5, %vm1361_vm6 }
 0x16b   :  { %982 = vmatprep.subr.bf16.mxu0 %v1804_v17  ;;  %1607 = vmatprep.subr.bf16.mxu1 %v1819_v33  ;;  %p1930_p7 = por %p1929_p6, %p1928_p5 }
 0x16d   :  { %p1931_p8 = pnand %p1930_p7, %p1924_p4 }
 0x16e   :  { %983 = vmatpush1.bf16.msra.mxu0 %v1802_v18  ;;  %1608 = vmatpush3.bf16.msra.mxu1 %v1820_v34 }
 0x16f   :  { %1624 = vmatprep.subr.bf16.mxu1 %v1965_v35 }
 0x171   :  { %985 = vmatmul.mubr.bf16.vlgmr.msra.gmra.mrb[4].mxu0 %v252_v63  ;;  %v1822_v63 = vld [vmem:[#allocation8 + $0x88] sm:$0xff]  }
 0x204   :  { %v1565_v36 = vpop.f32.mrb[4].mxu1 }
 0x205   :  { %v1566_v37 = vpop.f32.mrb[5].mxu1 }
 0x206   :  { %v1567_v38 = vadd.f32 %v1566_v37, %v1565_v36  ;;  %v1568_v39 = vpop.f32.mrb[6].mxu1 }
 0x207   :  { %v1569_v40 = vpop.f32.mrb[7].mxu1 }
 0x208   :  { %v1028_v46 = vadd.f32 %v1567_v38, %v395_v42 }
 0x224   :  { %v1587_v43 = vpop.f32.mrb[8].mxu1 }
 0x225   :  { %v1588_v45 = vpop.f32.mrb[9].mxu1 }
 0x226   :  { %v1589_v47 = vadd.f32 %v1588_v45, %v1587_v43  ;;  %v1590_v48 = vpop.f32.mrb[10].mxu1 }
 0x227   :  { %v1591_v49 = vpop.f32.mrb[11].mxu1 }
 0x228   :  { %v1068_v50 = vadd.f32 %v1589_v47, %v1028_v46 }
 0x22a   :  { %v1075_v7 = vmax.f32 %v1068_v50, 0.0 }
 0x22c   :  { %v1078_v8 = vpack.c.bf16 %v1075_v7, %v1075_v7 }
 0x244   :  { %v986_v53 = vpop.f32.mrb[4].mxu0 }
 0x245   :  { %v1644_v54 = vadd.f32 %v986_v53, %v387_v51  ;;  %v988_v55 = vpop.f32.mrb[5].mxu0 }
 0x246   :  { %v1645_v56 = vadd.f32 %v988_v55, %v391_v52  ;;  %v990_v57 = vpop.f32.mrb[6].mxu0 }
 0x247   :  { %v1073_v58 = vmax.f32 %v1644_v54, 0.0  ;;  %v991_v44 = vpop.f32.mrb[7].mxu0 }
 0x248   :  { %v1074_v59 = vmax.f32 %v1645_v56, 0.0 }
 0x249   :  { %v1076_v62 = vpack.c.bf16 %v1073_v58, %v1073_v58 }
 0x24a   :  { %v1077_v60 = vpack.c.bf16 %v1074_v59, %v1074_v59 }
 0x24c   :  { %1310 = vmatprep.mubr.bf16.mxu1 %v1077_v60 }
 0x24d   :  { %1311 = vmatmul.mubr.bf16.vlgmr.msra.gmra.mrb[12].mxu1 %v1076_v62 }
 0x24e   :  { %1625 = vmatpush3.bf16.msra.mxu1 %v1821_v61  ;;  %1640 = vmatprep.mubr.msk.bf16.mxu1 %vm1966_vm4, %v1965_v35 }
 0x24f   :  { %1626 = vmatprep.subr.bf16.mxu1 %v1965_v35 }
 0x252   :  { %1627 = vmatpush3.bf16.msra.mxu1 %v1822_v63 }
 0x253   :  { %1628 = vmatprep.subr.bf16.mxu1 %v1965_v35 }
 0x256   :  { %1629 = vmatpush3.bf16.msra.mxu1 %v1823_v3 }
 0x257   :  { %1630 = vmatprep.subr.bf16.mxu1 %v1965_v35 }
 0x25a   :  { %1631 = vmatpush3.bf16.msra.mxu1 %v1824_v4 }
 0x25b   :  { %1632 = vmatprep.subr.bf16.mxu1 %v1965_v35 }
 0x25e   :  { %1633 = vmatpush3.bf16.msra.mxu1 %v1825_v6 }
 0x25f   :  { %1634 = vmatprep.subr.bf16.mxu1 %v1965_v35 }
 0x262   :  { %1635 = vmatpush3.bf16.msra.mxu1 %v1826_v0 }
 0x263   :  { %1636 = vmatprep.subr.bf16.mxu1 %v1965_v35 }
 0x266   :  { %1637 = vmatpush3.bf16.msra.mxu1 %v1827_v1 }
 0x267   :  { %1638 = vmatprep.subr.bf16.mxu1 %v1965_v35 }
 0x26a   :  { %1639 = vmatpush3.bf16.msra.mxu1 %v1828_v5 }
 0x26d   :  { %1641 = vmatmul.mubr.bf16.vlgmr.msra.gmra.mrb[16].mxu1 %v1078_v8 }
 0x320   :  { %v1609_v9 = vpop.f32.mrb[12].mxu1 }
 0x321   :  { %v1610_v10 = vpop.f32.mrb[13].mxu1 }
 0x322   :  { %v1611_v11 = vadd.f32 %v1610_v10, %v1609_v9  ;;  %v1612_v12 = vpop.f32.mrb[14].mxu1 }
 0x323   :  { %v1613_v13 = vpop.f32.mrb[15].mxu1 }
 0x324   :  { %v1313_v16 = vadd.f32 %v1611_v11, %v1523_v14 }
 0x340   :  { %v1352_v17 = vpop.f32.mrb[16].mxu1 }
 0x341   :  { %v1353_v18 = vadd.f32 %v1352_v17, %v1313_v16  ;;  %v1642_v19 = vpop.f32.mrb[17].mxu1 }
 0x342   :  { %v1355_v20 = vpop.f32.mrb[18].mxu1 }
 0x343   :  { %v1363_v21 = vand.u32 2147483647, %v1353_v18  ;;  %v1643_v22 = vpop.f32.mrb[19].mxu1  ;;  %v1380_v36 = vmax.f32 %v1353_v18, 0.0  ;;  %vm1371_vm9 = vcmp.ge.f32.partialorder %v1353_v18, 0.0 }
 0x345   :  { %v1364_v23 = vmul.f32 2.0, %v1363_v21 }
 0x347   :  { %v1365_v24 = vsel %vm1362_vm7, %v1364_v23, %v1363_v21 }
 0x348   :  { %v1366_v25 = vsub.f32 0.0, %v1365_v24 }
 0x34a   :  { %v1367_v26 = vmul.f32 1.442695, %v1366_v25 }
 0x34c   :  { %1829 = vpow2.f32 %v1367_v26 }
 0x356   :  { %v1830_v27 = vpop.eup %1829 }
 0x357   :  { %v1369_v28 = vadd.f32 1.0, %v1830_v27  ;;  %v1384_v2 = vmul.f32 -0.5, %v1830_v27  ;;  %v1387_v30 = vand.u32 2147483647, %v1830_v27 }
 0x359   :  { %1831 = vrcp.f32 %v1369_v28  ;;  %v1385_v29 = vadd.f32 1.0, %v1384_v2  ;;  %vm1388_vm8 = vcmp.lt.f32.partialorder %v1387_v30, 0.0004427343 }
 0x35a   :  { %1833 = vlog2.f32 %v1369_v28 }
 0x35b   :  { %v1386_v35 = vmul.f32 %v1830_v27, %v1385_v29 }
 0x363   :  { %v1832_v31 = vpop.eup %1831 }
 0x364   :  { %v1834_v32 = vpop.eup %1833  ;;  %v1372_v33 = vsub.f32 1.0, %v1832_v31  ;;  %v1376_v38 = vmul.f32 2.0, %v1832_v31 }
 0x365   :  { %v1383_v34 = vmul.f32 0.6931472, %v1834_v32 }
 0x366   :  { %v1373_v40 = vsel %vm1371_vm9, %v1832_v31, %v1372_v33  ;;  %v1548_v43 = vadd.f32 -1.0, %v1376_v38  ;;  %v1378_v45 = vsub.f32 1.0, %v1376_v38 }
 0x367   :  { %v1389_v37 = vsel %vm1388_vm8, %v1386_v35, %v1383_v34  ;;  %v1374_v42 = vmax.f32 %v1373_v40, 0.01 }
 0x368   :  { %v1390_v39 = vadd.f32 %v1389_v37, %v1380_v36  ;;  %v1379_v49 = vsel %vm1371_vm9, %v1548_v43, %v1378_v45 }
 0x369   :  { %v1375_v48 = vmin.f32 %v1374_v42, 0.99 }
 0x36a   :  { %v1391_v41 = vadd.f32 0.01, %v1390_v39 }
 0x36c   :  { %v1392_v46 = vmax.f32 %v1391_v41, 0.1 }
 0x36e   :  { %v1393_v47 = vmin.f32 %v1392_v46, 1.0 }
 0x370   :  { %v1396_v50 = vsel %vm1395_vm10, %v1393_v47, %v1353_v18 }
 0x371   :  { %v1397_v51 = vsel %vm1361_vm6, %v1379_v49, %v1396_v50 }
 0x372   :  { %v1398_v52 = vsel %vm1394_vm11, %v1375_v48, %v1397_v51 }
 0x373   :  { %1399 = vst [vmem:[#allocation10] sm:$0xff] %v1398_v52 }
 0x374   :  { %1934 = shalt.err (!%p1931_p8)
}
 0x375   :  { %s1935_s12 = scalar_lea.hbm %s2115_s7, 128 }
 0x376   :  { %p1936_p9 = scmp.ne.s32.totalorder %s2115_s7, %s1935_s12  ;;  %p1939_p10 = scmp.lt.u32.totalorder %s1935_s12, %s2115_s7 }
 0x378   :  { %p1941_p11 = pnand %p1939_p10, %p1936_p9 }
 0x37a   :  { %1944 = shalt.err (!%p1941_p11)
}
 0x37b   :  { %1409 = dma.vmem_to_hbm [thread:$0]  %s1407_s8, 128, %s2115_s7, [#allocation4]  }
 0x37c   :  { %1951 = dma.done.wait [#allocation4], 128  }
 0x37d   :  { %1952 = vsyncadd [#allocation4], 4294967168 }
 0x37e   :  { %1413 = vsyncpa [#allocation3], 1 }
 0x37f   :  { %1414 = vsyncpa [#allocation6], 1 }
 0x380   :  { %1415 = vsyncpa [#allocation9], 1 }
 0x381   :  { %1416 = vsyncpa [#allocation4], 1 }

</bundles_post_ra>
